<compile_context>
chip_gen: v7x
topology: tpu7x:2x2x1
jax: 0.10.0
libtpu: 0.0.40
codegen_flags: <defaults>
</compile_context>

<pallas_src>
import functools
import math

import jax
import jax.numpy as jnp
from jax import lax
from jax.experimental import pallas as pl
from jax.experimental.pallas import tpu as pltpu


def _cdiv(a, b):
    return -(-a // b)


@functools.lru_cache(maxsize=None)
def _vmem_limit_bytes():
    """Per-generation scoped-VMEM limit (leave ~25% headroom for the compiler)."""
    try:
        cap = int(pltpu.get_tpu_info().vmem_capacity_bytes)
    except Exception:
        cap = 64 * 1024 * 1024
    return int(min(max(cap - cap // 4, 32 * 1024 * 1024), 112 * 1024 * 1024))


def _cosine_kernel(*refs, r, tm, chunk, n_chunks, bpc, packed_rows,
                   has_mask, needs_mask):
    """Masked cosine-distance partial reduction over one (tm, W) packed-row tile."""
    if has_mask:
        y_ref, z_ref, sel_ref, m_ref, num_ref, den_ref = refs
    else:
        y_ref, z_ref, sel_ref, num_ref, den_ref = refs
        m_ref = None

    c = pl.program_id(0)          # core slot (parallel axis)
    i = pl.program_id(1)          # row-block step for this core (arbitrary axis)
    gb = c * bpc + i              # unclamped global row-block index

    @pl.when(i == 0)
    def _init():
        num_ref[...] = jnp.zeros_like(num_ref)
        den_ref[...] = jnp.zeros_like(den_ref)

    sel = sel_ref[...]            # (W, r) bf16 0/1 segment selector

    def seg_sum(x):
        # Per-segment lane sums on the (otherwise idle) MXU, exact-ish for f32
        # inputs via a bf16 hi/lo split (selector entries are exact in bf16).
        hi = x.astype(jnp.bfloat16)
        lo = (x - hi.astype(jnp.float32)).astype(jnp.bfloat16)
        return (jnp.dot(hi, sel, preferred_element_type=jnp.float32) +
                jnp.dot(lo, sel, preferred_element_type=jnp.float32))

    def chunk_sums(k):
        s = k * chunk
        y = y_ref[pl.ds(s, chunk), :].astype(jnp.float32)     # (chunk, W)
        z = z_ref[pl.ds(s, chunk), :].astype(jnp.float32)
        dot = seg_sum(y * z)                                  # (chunk, r)
        ny2 = seg_sum(y * y)
        nz2 = seg_sum(z * z)
        # torch F.cosine_similarity: clamp the product of squared norms at eps^2.
        inv = lax.rsqrt(jnp.maximum(ny2 * nz2, jnp.float32(1e-16)))
        loss = 1.0 - dot * inv                                # (chunk, r)

        m = None
        if has_mask:
            m = m_ref[pl.ds(s, chunk), :].astype(jnp.float32)  # (chunk, r)
        if needs_mask:
            # Rows past the end of the (unpadded) input, or belonging to a
            # clamped duplicate block, are zeroed (NaN/Inf safe).
            row = gb * tm + s + lax.broadcasted_iota(jnp.int32, (chunk, 1), 0)
            valid = row < packed_rows
            loss = jnp.where(valid, loss, 0.0)
            if has_mask:
                m = jnp.where(valid, m, 0.0)
            else:
                m = jnp.where(valid, jnp.float32(1.0), jnp.float32(0.0))

        if has_mask:
            num_k = jnp.sum(loss * m).reshape(1, 1)
            den_k = jnp.sum(m).reshape(1, 1)
        elif needs_mask:
            num_k = jnp.sum(loss * m).reshape(1, 1)
            den_k = (jnp.sum(m) * jnp.float32(r)).reshape(1, 1)
        else:
            num_k = jnp.sum(loss).reshape(1, 1)
            den_k = jnp.full((1, 1), float(chunk * r), jnp.float32)
        return num_k, den_k

    if n_chunks == 1:
        num_s, den_s = chunk_sums(0)
    else:
        def body(k, carry):
            na, da = carry
            nk, dk = chunk_sums(k)
            return na + nk, da + dk

        zero = jnp.zeros((1, 1), jnp.float32)
        num_s, den_s = lax.fori_loop(0, n_chunks, body, (zero, zero),
                                     unroll=True)

    # Two scalar accumulations per step into the VMEM-resident per-core outputs.
    num_ref[...] += num_s.reshape(1, 1, 1)
    den_ref[...] += den_s.reshape(1, 1, 1)


@functools.partial(jax.jit, static_argnames=("block_rows", "chunk_rows"))
def semantic_cosine_loss(Y, z_pred, mask=None, *, block_rows=None,
                         chunk_rows=None):
    """SemanticLossWrapper(loss_type='cosine').forward as a Pallas TPU kernel.

    Returns NaN when a provided mask sums to zero (matches the reference).
    `block_rows` / `chunk_rows` are test-only overrides of the tile geometry.
    """
    assert Y.shape == z_pred.shape, (
        f"Shape mismatch: Y {Y.shape}, z_pred {z_pred.shape}")
    if Y.dtype not in (jnp.float32, jnp.bfloat16, jnp.float16):
        Y = Y.astype(jnp.float32)
    if z_pred.dtype != Y.dtype:
        z_pred = z_pred.astype(Y.dtype)

    *lead, D = Y.shape
    N = int(math.prod(lead)) if lead else 1

    # Lane-dense packing: fold r consecutive logical rows into one packed row
    # so the packed row width W = r*D is a multiple of 128 lanes (metadata only).
    r = 128 // math.gcd(D, 128)
    if r > 1 and N % r != 0:
        r = 1                                      # unpacked fallback
    R = N // r                                     # packed rows
    W = r * D                                      # lanes per packed row

    y2 = Y.reshape(R, W)
    z2 = z_pred.reshape(R, W)

    has_mask = mask is not None
    if has_mask:
        assert mask.size == N, f"mask has {mask.size} elements, expected {N}"
        m2 = jnp.reshape(mask, (R, r)).astype(jnp.float32)

    # 0/1 segment selector (exact in bf16): column j sums the lanes of logical
    # row j inside a packed row.
    sel = (jnp.arange(W, dtype=jnp.int32)[:, None] // D
           == jnp.arange(r, dtype=jnp.int32)[None, :]).astype(jnp.bfloat16)

    # ---- tile geometry ----------------------------------------------------
    itemsize = jnp.dtype(Y.dtype).itemsize
    sub = 8 if itemsize >= 4 else 16               # sublane multiple per dtype
    if chunk_rows is None:                         # ~512 KiB f32 per compute chunk
        chunk = max(sub, min(2048, ((131072 // max(W, 1)) // sub) * sub))
    else:
        chunk = max(sub, (int(chunk_rows) // sub) * sub)

    if R <= chunk:
        chunk, n_chunks, tm = R, 1, R              # single full-extent block
    else:
        if block_rows is None:                     # ~4 MiB f32 per input tile
            n_chunks = max(1, min(8, (1 << 20) // (chunk * W)))
        else:
            n_chunks = max(1, int(block_rows) // chunk)
        n_chunks = max(1, min(n_chunks, R // chunk))
        tm = chunk * n_chunks

    nblocks = _cdiv(R, tm)
    num_cores = 2 if nblocks >= 2 else 1           # use both TCs on v7x
    bpc = _cdiv(nblocks, num_cores)                # row blocks per core
    needs_mask = (R % tm != 0) or (num_cores * bpc != nblocks)

    def _row_block(c, i):
        # Clamp so the DMA never goes past the array; clamped duplicate blocks
        # are zeroed in-kernel via the row-validity mask.
        return jnp.minimum(c * bpc + i, nblocks - 1)

    in_specs = [
        pl.BlockSpec((tm, W), lambda c, i: (_row_block(c, i), 0)),
        pl.BlockSpec((tm, W), lambda c, i: (_row_block(c, i), 0)),
        pl.BlockSpec((W, r), lambda c, i: (0, 0)),   # selector stays resident
    ]
    args = [y2, z2, sel]
    if has_mask:
        in_specs.append(pl.BlockSpec((tm, r), lambda c, i: (_row_block(c, i), 0)))
        args.append(m2)

    kernel = functools.partial(
        _cosine_kernel, r=r, tm=tm, chunk=chunk, n_chunks=n_chunks, bpc=bpc,
        packed_rows=R, has_mask=has_mask, needs_mask=needs_mask)

    num, den = pl.pallas_call(
        kernel,
        out_shape=(
            jax.ShapeDtypeStruct((num_cores, 1, 1), jnp.float32),
            jax.ShapeDtypeStruct((num_cores, 1, 1), jnp.float32),
        ),
        grid_spec=pltpu.PrefetchScalarGridSpec(
            num_scalar_prefetch=0,
            grid=(num_cores, bpc),
            in_specs=in_specs,
            out_specs=[
                pl.BlockSpec((1, 1, 1), lambda c, i: (c, 0, 0)),
                pl.BlockSpec((1, 1, 1), lambda c, i: (c, 0, 0)),
            ],
        ),
        compiler_params=pltpu.CompilerParams(
            dimension_semantics=("parallel", "arbitrary"),
            vmem_limit_bytes=_vmem_limit_bytes(),
        ),
    )(*args)

    return jnp.sum(num) / jnp.sum(den)


def _reference_cosine_loss(Y, z_pred, mask=None):
    """Pure-JAX reference with PyTorch F.cosine_similarity eps semantics."""
    Y = Y.astype(jnp.float32)
    z = z_pred.astype(jnp.float32)
    dot = jnp.sum(Y * z, axis=-1)
    n2 = jnp.sum(Y * Y, axis=-1) * jnp.sum(z * z, axis=-1)
    cos = dot / jnp.sqrt(jnp.maximum(n2, 1e-16))
    loss = (1.0 - cos).reshape(-1)
    if mask is not None:
        m = mask.reshape(-1).astype(jnp.float32)
        return jnp.sum(loss * m) / jnp.sum(m)
    return jnp.mean(loss)


if __name__ == "__main__":
    # SemanticLossWrapper(loss_type='cosine') has no learnable parameters.
    # TODO(synk): loss_type='diffusion' (DiffLoss MLP + DDPM sampling) not implemented.
    key = jax.random.PRNGKey(0)
    kY, kZ, kM = jax.random.split(key, 3)

    def check(out, ref, tol, name):
        out = jax.block_until_ready(out)
        assert jnp.allclose(out, ref, atol=tol, rtol=tol), (name, out, ref)

    # 1) Primary small example (B, K, D) = (2, 16, 32): packed r=4, W=128,
    #    single block, with and without a mask.
    B, K, D = 2, 16, 32
    Y = jax.random.normal(kY, (B, K, D), jnp.float32)
    Z = jax.random.normal(kZ, (B, K, D), jnp.float32)
    M = (jax.random.uniform(kM, (B, K)) > 0.3).astype(jnp.float32)
    check(semantic_cosine_loss(Y, Z, M), _reference_cosine_loss(Y, Z, M),
          5e-5, "masked")
    check(semantic_cosine_loss(Y, Z, None), _reference_cosine_loss(Y, Z),
          5e-5, "unmasked")

    # 2) Multi-block grid with a partial tail block, an odd block count
    #    (exercises the clamped 2-core split) and >1 in-kernel chunks.
    B2, K2, D2 = 2, 100, 32
    Y2 = jax.random.normal(kY, (B2, K2, D2), jnp.float32)
    Z2 = jax.random.normal(kZ, (B2, K2, D2), jnp.float32)
    M2 = (jax.random.uniform(kM, (B2, K2)) > 0.5).astype(jnp.float32)
    check(semantic_cosine_loss(Y2, Z2, M2, block_rows=24, chunk_rows=8),
          _reference_cosine_loss(Y2, Z2, M2), 5e-5, "multi-block")

    # 3) D=48 (128 % D != 0): generalized lane packing r=8, W=384.
    B3, K3, D3 = 2, 32, 48
    Y3 = jax.random.normal(kY, (B3, K3, D3), jnp.float32)
    Z3 = jax.random.normal(kZ, (B3, K3, D3), jnp.float32)
    check(semantic_cosine_loss(Y3, Z3, None), _reference_cosine_loss(Y3, Z3),
          5e-5, "D=48 packed")

    # 4) Row count not divisible by the packing factor -> r=1 fallback path.
    B4, K4, D4 = 2, 7, 48
    Y4 = jax.random.normal(kY, (B4, K4, D4), jnp.float32)
    Z4 = jax.random.normal(kZ, (B4, K4, D4), jnp.float32)
    M4 = (jax.random.uniform(kM, (B4, K4)) > 0.4).astype(jnp.float32)
    check(semantic_cosine_loss(Y4, Z4, M4), _reference_cosine_loss(Y4, Z4, M4),
          5e-5, "r=1 fallback")

    # 5) bf16 inputs stream as bf16 (halved HBM traffic), upcast in-kernel.
    Yb, Zb = Y.astype(jnp.bfloat16), Z.astype(jnp.bfloat16)
    check(semantic_cosine_loss(Yb, Zb, M),
          _reference_cosine_loss(Yb.astype(jnp.float32),
                                 Zb.astype(jnp.float32), M),
          1e-3, "bf16")

    print("KERNEL_OK")
</pallas_src>

<mosaic_0001>
module attributes {stable_mosaic.version = 11 : i64} {
  func.func @_cosine_kernel(%arg0: i32, %arg1: i32, %arg2: memref<8x128xf32, #tpu.memory_space<vmem>>, %arg3: memref<8x128xf32, #tpu.memory_space<vmem>>, %arg4: memref<128x4xbf16, #tpu.memory_space<vmem>>, %arg5: memref<8x4xf32, #tpu.memory_space<vmem>>, %arg6: memref<1x1x1xf32, #tpu.memory_space<vmem>>, %arg7: memref<1x1x1xf32, #tpu.memory_space<vmem>>) attributes {dimension_semantics = [#tpu.dimension_semantics<parallel>, #tpu.dimension_semantics<arbitrary>], iteration_bounds = array<i64: 1, 1>, scalar_prefetch = 0 : i64, scratch_operands = 0 : i64, tpu.core_type = #tpu.core_type<tc>, window_params = [{transform_indices = @transform_0, window_bounds = array<i64: 8, 128>}, {transform_indices = @transform_1, window_bounds = array<i64: 8, 128>}, {pipeline_mode = #tpu.pipeline_mode<synchronous>, transform_indices = @transform_2, window_bounds = array<i64: 128, 4>}, {transform_indices = @transform_3, window_bounds = array<i64: 8, 4>}, {transform_indices = @transform_4, window_bounds = array<i64: 1, 1, 1>}, {transform_indices = @transform_5, window_bounds = array<i64: 1, 1, 1>}]} {
    %c0_i32 = arith.constant 0 : i32
    %0 = arith.cmpi eq, %arg1, %c0_i32 : i32
    %1 = arith.extui %0 : i1 to i32
    %c0_i32_0 = arith.constant 0 : i32
    %2 = arith.cmpi ne, %1, %c0_i32_0 : i32
    scf.if %2 {
      %cst_29 = arith.constant 0.000000e+00 : f32
      %57 = vector.broadcast %cst_29 : f32 to vector<1x1x1xf32>
      %c0_30 = arith.constant 0 : index
      %c0_31 = arith.constant 0 : index
      %c0_32 = arith.constant 0 : index
      %58 = vector.load %arg6[%c0_30, %c0_31, %c0_32] : memref<1x1x1xf32, #tpu.memory_space<vmem>>, vector<1x1x1xf32>
      tpu.vector_store %arg6[%c0_30, %c0_31, %c0_32], %57 {strides = array<i32>} : memref<1x1x1xf32, #tpu.memory_space<vmem>>, vector<1x1x1xf32>,
      %cst_33 = arith.constant 0.000000e+00 : f32
      %59 = vector.broadcast %cst_33 : f32 to vector<1x1x1xf32>
      %c0_34 = arith.constant 0 : index
      %c0_35 = arith.constant 0 : index
      %c0_36 = arith.constant 0 : index
      %60 = vector.load %arg7[%c0_34, %c0_35, %c0_36] : memref<1x1x1xf32, #tpu.memory_space<vmem>>, vector<1x1x1xf32>
      tpu.vector_store %arg7[%c0_34, %c0_35, %c0_36], %59 {strides = array<i32>} : memref<1x1x1xf32, #tpu.memory_space<vmem>>, vector<1x1x1xf32>,
    } else {
    }
    %c0 = arith.constant 0 : index
    %c0_1 = arith.constant 0 : index
    %3 = vector.load %arg4[%c0, %c0_1] : memref<128x4xbf16, #tpu.memory_space<vmem>>, vector<128x4xbf16>
    %c0_2 = arith.constant 0 : index
    %c0_3 = arith.constant 0 : index
    %4 = vector.load %arg2[%c0_2, %c0_3] : memref<8x128xf32, #tpu.memory_space<vmem>>, vector<8x128xf32>
    %c0_4 = arith.constant 0 : index
    %c0_5 = arith.constant 0 : index
    %5 = vector.load %arg3[%c0_4, %c0_5] : memref<8x128xf32, #tpu.memory_space<vmem>>, vector<8x128xf32>
    %6 = arith.mulf %4, %5 : vector<8x128xf32>
    %7 = arith.truncf %6 : vector<8x128xf32> to vector<8x128xbf16>
    %8 = arith.extf %7 : vector<8x128xbf16> to vector<8x128xf32>
    %9 = arith.subf %6, %8 : vector<8x128xf32>
    %10 = arith.truncf %9 : vector<8x128xf32> to vector<8x128xbf16>
    %cst = arith.constant dense<0.000000e+00> : vector<8x4xf32>
    %11 = tpu.matmul %7, %3, %cst {dimension_numbers = #tpu.dot_dimension_numbers<[1], [0], [0], [1], [0, 0, 1, 1], [], []>} : vector<8x128xbf16>, vector<128x4xbf16>, vector<8x4xf32> -> vector<8x4xf32>
    %cst_6 = arith.constant dense<0.000000e+00> : vector<8x4xf32>
    %12 = tpu.matmul %10, %3, %cst_6 {dimension_numbers = #tpu.dot_dimension_numbers<[1], [0], [0], [1], [0, 0, 1, 1], [], []>} : vector<8x128xbf16>, vector<128x4xbf16>, vector<8x4xf32> -> vector<8x4xf32>
    %13 = arith.addf %11, %12 : vector<8x4xf32>
    %14 = arith.mulf %4, %4 : vector<8x128xf32>
    %15 = arith.truncf %14 : vector<8x128xf32> to vector<8x128xbf16>
    %16 = arith.extf %15 : vector<8x128xbf16> to vector<8x128xf32>
    %17 = arith.subf %14, %16 : vector<8x128xf32>
    %18 = arith.truncf %17 : vector<8x128xf32> to vector<8x128xbf16>
    %cst_7 = arith.constant dense<0.000000e+00> : vector<8x4xf32>
    %19 = tpu.matmul %15, %3, %cst_7 {dimension_numbers = #tpu.dot_dimension_numbers<[1], [0], [0], [1], [0, 0, 1, 1], [], []>} : vector<8x128xbf16>, vector<128x4xbf16>, vector<8x4xf32> -> vector<8x4xf32>
    %cst_8 = arith.constant dense<0.000000e+00> : vector<8x4xf32>
    %20 = tpu.matmul %18, %3, %cst_8 {dimension_numbers = #tpu.dot_dimension_numbers<[1], [0], [0], [1], [0, 0, 1, 1], [], []>} : vector<8x128xbf16>, vector<128x4xbf16>, vector<8x4xf32> -> vector<8x4xf32>
    %21 = arith.addf %19, %20 : vector<8x4xf32>
    %22 = arith.mulf %5, %5 : vector<8x128xf32>
    %23 = arith.truncf %22 : vector<8x128xf32> to vector<8x128xbf16>
    %24 = arith.extf %23 : vector<8x128xbf16> to vector<8x128xf32>
    %25 = arith.subf %22, %24 : vector<8x128xf32>
    %26 = arith.truncf %25 : vector<8x128xf32> to vector<8x128xbf16>
    %cst_9 = arith.constant dense<0.000000e+00> : vector<8x4xf32>
    %27 = tpu.matmul %23, %3, %cst_9 {dimension_numbers = #tpu.dot_dimension_numbers<[1], [0], [0], [1], [0, 0, 1, 1], [], []>} : vector<8x128xbf16>, vector<128x4xbf16>, vector<8x4xf32> -> vector<8x4xf32>
    %cst_10 = arith.constant dense<0.000000e+00> : vector<8x4xf32>
    %28 = tpu.matmul %26, %3, %cst_10 {dimension_numbers = #tpu.dot_dimension_numbers<[1], [0], [0], [1], [0, 0, 1, 1], [], []>} : vector<8x128xbf16>, vector<128x4xbf16>, vector<8x4xf32> -> vector<8x4xf32>
    %29 = arith.addf %27, %28 : vector<8x4xf32>
    %30 = arith.mulf %21, %29 : vector<8x4xf32>
    %cst_11 = arith.constant 1.000000e-16 : f32
    %31 = vector.broadcast %cst_11 : f32 to vector<8x4xf32>
    %32 = arith.maximumf %30, %31 : vector<8x4xf32>
    %33 = math.rsqrt %32 : vector<8x4xf32>
    %34 = arith.mulf %13, %33 : vector<8x4xf32>
    %cst_12 = arith.constant 1.000000e+00 : f32
    %35 = vector.broadcast %cst_12 : f32 to vector<8x4xf32>
    %36 = arith.subf %35, %34 : vector<8x4xf32>
    %c0_13 = arith.constant 0 : index
    %c0_14 = arith.constant 0 : index
    %37 = vector.load %arg5[%c0_13, %c0_14] : memref<8x4xf32, #tpu.memory_space<vmem>>, vector<8x4xf32>
    %38 = arith.mulf %36, %37 : vector<8x4xf32>
    %39 = vector.shape_cast %38 : vector<8x4xf32> to vector<1x8x4xf32>
    %cst_15 = arith.constant dense<0.000000e+00> : vector<1xf32>
    %40 = vector.multi_reduction <add>, %39, %cst_15 [1, 2] : vector<1x8x4xf32> to vector<1xf32>
    %41 = vector.shape_cast %40 : vector<1xf32> to vector<1x1x1xf32>
    %42 = vector.extract %41[0, 0, 0] : f32 from vector<1x1x1xf32>
    %43 = vector.broadcast %42 : f32 to vector<1x1xf32>
    %44 = vector.shape_cast %37 : vector<8x4xf32> to vector<1x8x4xf32>
    %cst_16 = arith.constant dense<0.000000e+00> : vector<1xf32>
    %45 = vector.multi_reduction <add>, %44, %cst_16 [1, 2] : vector<1x8x4xf32> to vector<1xf32>
    %46 = vector.shape_cast %45 : vector<1xf32> to vector<1x1x1xf32>
    %47 = vector.extract %46[0, 0, 0] : f32 from vector<1x1x1xf32>
    %48 = vector.broadcast %47 : f32 to vector<1x1xf32>
    %c0_17 = arith.constant 0 : index
    %c0_18 = arith.constant 0 : index
    %c0_19 = arith.constant 0 : index
    %49 = vector.load %arg6[%c0_17, %c0_18, %c0_19] : memref<1x1x1xf32, #tpu.memory_space<vmem>>, vector<1x1x1xf32>
    %50 = vector.shape_cast %43 : vector<1x1xf32> to vector<1x1x1xf32>
    %51 = arith.addf %49, %50 : vector<1x1x1xf32>
    %c0_20 = arith.constant 0 : index
    %c0_21 = arith.constant 0 : index
    %c0_22 = arith.constant 0 : index
    %52 = vector.load %arg6[%c0_20, %c0_21, %c0_22] : memref<1x1x1xf32, #tpu.memory_space<vmem>>, vector<1x1x1xf32>
    tpu.vector_store %arg6[%c0_20, %c0_21, %c0_22], %51 {strides = array<i32>} : memref<1x1x1xf32, #tpu.memory_space<vmem>>, vector<1x1x1xf32>,
    %c0_23 = arith.constant 0 : index
    %c0_24 = arith.constant 0 : index
    %c0_25 = arith.constant 0 : index
    %53 = vector.load %arg7[%c0_23, %c0_24, %c0_25] : memref<1x1x1xf32, #tpu.memory_space<vmem>>, vector<1x1x1xf32>
    %54 = vector.shape_cast %48 : vector<1x1xf32> to vector<1x1x1xf32>
    %55 = arith.addf %53, %54 : vector<1x1x1xf32>
    %c0_26 = arith.constant 0 : index
    %c0_27 = arith.constant 0 : index
    %c0_28 = arith.constant 0 : index
    %56 = vector.load %arg7[%c0_26, %c0_27, %c0_28] : memref<1x1x1xf32, #tpu.memory_space<vmem>>, vector<1x1x1xf32>
    tpu.vector_store %arg7[%c0_26, %c0_27, %c0_28], %55 {strides = array<i32>} : memref<1x1x1xf32, #tpu.memory_space<vmem>>, vector<1x1x1xf32>,
    return
  }
  func.func @transform_0(%arg0: i32, %arg1: i32) -> (i32, i32) {
    %c1_i32 = arith.constant 1 : i32
    %0 = arith.muli %arg0, %c1_i32 : i32
    %1 = arith.addi %0, %arg1 : i32
    %c0_i32 = arith.constant 0 : i32
    %2 = arith.minsi %1, %c0_i32 : i32
    %c0_i32_0 = arith.constant 0 : i32
    %c0_i32_1 = arith.constant 0 : i32
    return %2, %c0_i32_0 : i32, i32
  }
  func.func @transform_1(%arg0: i32, %arg1: i32) -> (i32, i32) {
    %c1_i32 = arith.constant 1 : i32
    %0 = arith.muli %arg0, %c1_i32 : i32
    %1 = arith.addi %0, %arg1 : i32
    %c0_i32 = arith.constant 0 : i32
    %2 = arith.minsi %1, %c0_i32 : i32
    %c0_i32_0 = arith.constant 0 : i32
    %c0_i32_1 = arith.constant 0 : i32
    return %2, %c0_i32_0 : i32, i32
  }
  func.func @transform_2(%arg0: i32, %arg1: i32) -> (i32, i32) {
    %c0_i32 = arith.constant 0 : i32
    %c0_i32_0 = arith.constant 0 : i32
    %c0_i32_1 = arith.constant 0 : i32
    return %c0_i32, %c0_i32_0 : i32, i32
  }
  func.func @transform_3(%arg0: i32, %arg1: i32) -> (i32, i32) {
    %c1_i32 = arith.constant 1 : i32
    %0 = arith.muli %arg0, %c1_i32 : i32
    %1 = arith.addi %0, %arg1 : i32
    %c0_i32 = arith.constant 0 : i32
    %2 = arith.minsi %1, %c0_i32 : i32
    %c0_i32_0 = arith.constant 0 : i32
    %c0_i32_1 = arith.constant 0 : i32
    return %2, %c0_i32_0 : i32, i32
  }
  func.func @transform_4(%arg0: i32, %arg1: i32) -> (i32, i32, i32) {
    %c0_i32 = arith.constant 0 : i32
    %c0_i32_0 = arith.constant 0 : i32
    %c0_i32_1 = arith.constant 0 : i32
    return %arg0, %c0_i32, %c0_i32_0 : i32, i32, i32
  }
  func.func @transform_5(%arg0: i32, %arg1: i32) -> (i32, i32, i32) {
    %c0_i32 = arith.constant 0 : i32
    %c0_i32_0 = arith.constant 0 : i32
    %c0_i32_1 = arith.constant 0 : i32
    return %arg0, %c0_i32, %c0_i32_0 : i32, i32, i32
  }
}

</mosaic_0001>

<bundles_post_ra>
// kernel: semantic_cosine_loss.1
= control target key start
LH: loop header
LB: loop body
LE: loop exit
PB: predicated region body
PF: predicated region fallthrough
CT: control target
= control target key end

     0   :  { %11 = vsyncpa [#allocation3], 0  ;;  %v771_v1 = vmov 0.0   ;;  %vm772_vm0 = vmmov 0   ;;  %s992_s0 = inlined_call_operand.vmem [shape: f32[8,128], index: 0, kind: input, shape index: {}]   ;;  %s993_s1 = inlined_call_operand.vmem [shape: f32[8,128], index: 1, kind: input, shape index: {}]   ;;  %s994_s2 = inlined_call_operand.vmem [shape: bf16[128,4], index: 2, kind: input, shape index: {}]   ;;  %s995_s3 = inlined_call_operand.vmem [shape: f32[8,4], index: 3, kind: input, shape index: {}]   ;;  %s996_s4 = inlined_call_operand.hbm [shape: f32[1,1,1], index: 4, kind: output, shape index: {0}]   ;;  %s997_s5 = inlined_call_operand.hbm [shape: f32[1,1,1], index: 5, kind: output, shape index: {1}]  }
   0x1   :  { %v808_v0 = vld [vmem:[%s994_s2] sm:$0xff]   ;;  %576 = vmatprep.subr.bf16.mxu1 %v771_v1  ;;  %596 = vmatprep.subr.bf16.mxu0 %v771_v1  ;;  %v817_v2 = vld [vmem:[%s994_s2 + $0x8] sm:$0xff]   ;;  %v830_v3 = vld [vmem:[%s994_s2 + $0x10] sm:$0xff]  }
   0x2   :  { %577 = vmatpush3.bf16.msra.mxu1 %v808_v0  ;;  %597 = vmatpush3.bf16.msra.mxu0 %v808_v0 }
   0x3   :  { %578 = vmatprep.subr.bf16.mxu1 %v771_v1  ;;  %598 = vmatprep.subr.bf16.mxu0 %v771_v1 }
   0x4   :  { %592 = vmatprep.mubr.msk.bf16.mxu1 %vm772_vm0, %v771_v1  ;;  %612 = vmatprep.mubr.msk.bf16.mxu0 %vm772_vm0, %v771_v1 }
   0x6   :  { %579 = vmatpush3.bf16.msra.mxu1 %v817_v2  ;;  %599 = vmatpush3.bf16.msra.mxu0 %v817_v2 }
   0x7   :  { %580 = vmatprep.subr.bf16.mxu1 %v771_v1  ;;  %600 = vmatprep.subr.bf16.mxu0 %v771_v1 }
   0x8   :  { %12 = vsyncpa [#allocation5], 0  ;;  %v839_v4 = vld [vmem:[%s994_s2 + $0x18] sm:$0xff]   ;;  %v126_v5 = vld [vmem:[%s992_s0] sm:$0xff]  ;;  %vm438_vm1 = vcmask 31744   ;;  %vm107_vm2 = vcmask 0  }
   0x9   :  { %v127_v6 = vld [vmem:[%s993_s1] sm:$0xff]  ;;  %v863_v10 = vld [vmem:[%s994_s2 + $0x28] sm:$0xff]   ;;  %v872_v12 = vld [vmem:[%s994_s2 + $0x30] sm:$0xff]   ;;  %v261_v16 = vmul.f32 %v126_v5, %v126_v5  ;;  %108 = vst.msk [vmem:[#allocation2] sm:$0x1] %vm107_vm2, %v771_v1  ;;  %s774_s14 = smov [#allocation4]  }
   0xa   :  { %581 = vmatpush3.bf16.msra.mxu1 %v830_v3  ;;  %601 = vmatpush3.bf16.msra.mxu0 %v830_v3  ;;  %v128_v7 = vmul.f32 %v127_v6, %v126_v5  ;;  %v854_v8 = vld [vmem:[%s994_s2 + $0x20] sm:$0xff]   ;;  %v881_v14 = vld [vmem:[%s994_s2 + $0x38] sm:$0xff]   ;;  %v346_v17 = vmul.f32 %v127_v6, %v127_v6  ;;  %109 = vst.msk [vmem:[#allocation4] sm:$0x1] %vm107_vm2, %v771_v1  ;;  %s484_s15 = sshll.u32 %s774_s14, 4  ;;  %s485_s15 = int_to_ptr.vmem [resolvable:$true] %s484_s15 }
   0xb   :  { %582 = vmatprep.subr.bf16.mxu1 %v771_v1  ;;  %602 = vmatprep.subr.bf16.mxu0 %v771_v1  ;;  %v262_v18 = vpack.c.bf16 %v261_v16, %v261_v16  ;;  %v436_v47 = vld [vmem:[%s995_s3] sm:$0xff]  ;;  %s773_s3 = smov [#allocation2]  }
   0xc   :  { %v129_v9 = vpack.c.bf16 %v128_v7, %v128_v7  ;;  %v347_v19 = vpack.c.bf16 %v346_v17, %v346_v17  ;;  %v449_v51 = vsel %vm438_vm1, %v436_v47, 0.0  ;;  %s474_s12 = sshll.u32 %s773_s3, 4  ;;  %s475_s12 = int_to_ptr.vmem [resolvable:$true] %s474_s12 }
   0xd   :  { %v263_v20 = vunpack.c.l.bf16 %v262_v18  ;;  %s723_s17 = scalar_lea.vmem %s475_s12, 16  ;;  %s727_s18 = scalar_lea.vmem %s475_s12, 32 }
   0xe   :  { %583 = vmatpush3.bf16.msra.mxu1 %v839_v4  ;;  %603 = vmatpush3.bf16.msra.mxu0 %v839_v4  ;;  %v130_v11 = vunpack.c.l.bf16 %v129_v9  ;;  %v348_v21 = vunpack.c.l.bf16 %v347_v19  ;;  %p724_p0 = scmp.ne.s32.totalorder %s475_s12, %s723_s17  ;;  %p728_p1 = scmp.lt.s32.totalorder %s475_s12, %s475_s12 }
   0xf   :  { %584 = vmatprep.subr.bf16.mxu1 %v771_v1  ;;  %604 = vmatprep.subr.bf16.mxu0 %v771_v1  ;;  %v264_v22 = vsub.f32 %v261_v16, %v263_v20  ;;  %p729_p2 = scmp.lt.s32.totalorder %s727_s18, %s723_s17 }
  0x10   :  { %v131_v13 = vsub.f32 %v128_v7, %v130_v11  ;;  %v349_v23 = vsub.f32 %v346_v17, %v348_v21 }
  0x11   :  { %v265_v24 = vpack.c.bf16 %v264_v22, %v264_v22  ;;  %v464_v5 = vld [vmem:[#allocation4] sm:$0x1]  ;;  %p730_p3 = por %p729_p2, %p728_p1 }
  0x12   :  { %585 = vmatpush3.bf16.msra.mxu1 %v854_v8  ;;  %605 = vmatpush3.bf16.msra.mxu0 %v854_v8  ;;  %v132_v15 = vpack.c.bf16 %v131_v13, %v131_v13  ;;  %v350_v25 = vpack.c.bf16 %v349_v23, %v349_v23 }
  0x13   :  { %586 = vmatprep.subr.bf16.mxu1 %v771_v1  ;;  %606 = vmatprep.subr.bf16.mxu0 %v771_v1  ;;  %p731_p4 = pnand %p730_p3, %p724_p0 }
  0x16   :  { %587 = vmatpush3.bf16.msra.mxu1 %v863_v10  ;;  %607 = vmatpush3.bf16.msra.mxu0 %v863_v10 }
  0x17   :  { %588 = vmatprep.subr.bf16.mxu1 %v771_v1  ;;  %608 = vmatprep.subr.bf16.mxu0 %v771_v1 }
  0x1a   :  { %589 = vmatpush3.bf16.msra.mxu1 %v872_v12  ;;  %609 = vmatpush3.bf16.msra.mxu0 %v872_v12 }
  0x1b   :  { %590 = vmatprep.subr.bf16.mxu1 %v771_v1  ;;  %610 = vmatprep.subr.bf16.mxu0 %v771_v1 }
  0x1e   :  { %591 = vmatpush3.bf16.msra.mxu1 %v881_v14  ;;  %611 = vmatpush3.bf16.msra.mxu0 %v881_v14 }
  0x1f   :  { %616 = vmatprep.subr.bf16.mxu1 %v771_v1  ;;  %656 = vmatprep.subr.bf16.mxu0 %v771_v1 }
  0x21   :  { %593 = vmatmul.mubr.bf16.vlgmr.msra.gmra.mrb[0].mxu1 %v132_v15  ;;  %613 = vmatmul.mubr.bf16.vlgmr.msra.gmra.mrb[0].mxu0 %v129_v9 }
  0x22   :  { %617 = vmatpush3.bf16.msra.mxu1 %v808_v0  ;;  %657 = vmatpush3.bf16.msra.mxu0 %v808_v0 }
  0x23   :  { %618 = vmatprep.subr.bf16.mxu1 %v771_v1  ;;  %658 = vmatprep.subr.bf16.mxu0 %v771_v1 }
  0x24   :  { %632 = vmatprep.mubr.msk.bf16.mxu1 %vm772_vm0, %v771_v1  ;;  %672 = vmatprep.mubr.msk.bf16.mxu0 %vm772_vm0, %v771_v1 }
  0x26   :  { %619 = vmatpush3.bf16.msra.mxu1 %v817_v2  ;;  %659 = vmatpush3.bf16.msra.mxu0 %v817_v2 }
  0x27   :  { %620 = vmatprep.subr.bf16.mxu1 %v771_v1  ;;  %660 = vmatprep.subr.bf16.mxu0 %v771_v1 }
  0x2a   :  { %621 = vmatpush3.bf16.msra.mxu1 %v830_v3  ;;  %661 = vmatpush3.bf16.msra.mxu0 %v830_v3 }
  0x2b   :  { %622 = vmatprep.subr.bf16.mxu1 %v771_v1  ;;  %662 = vmatprep.subr.bf16.mxu0 %v771_v1 }
  0x2e   :  { %623 = vmatpush3.bf16.msra.mxu1 %v839_v4  ;;  %663 = vmatpush3.bf16.msra.mxu0 %v839_v4 }
  0x2f   :  { %624 = vmatprep.subr.bf16.mxu1 %v771_v1  ;;  %664 = vmatprep.subr.bf16.mxu0 %v771_v1 }
  0x32   :  { %625 = vmatpush3.bf16.msra.mxu1 %v854_v8  ;;  %665 = vmatpush3.bf16.msra.mxu0 %v854_v8 }
  0x33   :  { %626 = vmatprep.subr.bf16.mxu1 %v771_v1  ;;  %666 = vmatprep.subr.bf16.mxu0 %v771_v1 }
  0x36   :  { %627 = vmatpush3.bf16.msra.mxu1 %v863_v10  ;;  %667 = vmatpush3.bf16.msra.mxu0 %v863_v10 }
  0x37   :  { %628 = vmatprep.subr.bf16.mxu1 %v771_v1  ;;  %668 = vmatprep.subr.bf16.mxu0 %v771_v1 }
  0x3a   :  { %629 = vmatpush3.bf16.msra.mxu1 %v872_v12  ;;  %669 = vmatpush3.bf16.msra.mxu0 %v872_v12 }
  0x3b   :  { %630 = vmatprep.subr.bf16.mxu1 %v771_v1  ;;  %670 = vmatprep.subr.bf16.mxu0 %v771_v1 }
  0x3e   :  { %631 = vmatpush3.bf16.msra.mxu1 %v881_v14  ;;  %671 = vmatpush3.bf16.msra.mxu0 %v881_v14 }
  0x3f   :  { %636 = vmatprep.subr.bf16.mxu1 %v771_v1  ;;  %676 = vmatprep.subr.bf16.mxu0 %v771_v1 }
  0x41   :  { %633 = vmatmul.mubr.bf16.vlgmr.msra.gmra.mrb[4].mxu1 %v265_v24  ;;  %673 = vmatmul.mubr.bf16.vlgmr.msra.gmra.mrb[4].mxu0 %v350_v25 }
  0x42   :  { %637 = vmatpush3.bf16.msra.mxu1 %v808_v0  ;;  %677 = vmatpush3.bf16.msra.mxu0 %v808_v0 }
  0x43   :  { %638 = vmatprep.subr.bf16.mxu1 %v771_v1  ;;  %678 = vmatprep.subr.bf16.mxu0 %v771_v1 }
  0x44   :  { %652 = vmatprep.mubr.msk.bf16.mxu1 %vm772_vm0, %v771_v1  ;;  %692 = vmatprep.mubr.msk.bf16.mxu0 %vm772_vm0, %v771_v1 }
  0x46   :  { %639 = vmatpush3.bf16.msra.mxu1 %v817_v2  ;;  %679 = vmatpush3.bf16.msra.mxu0 %v817_v2 }
  0x47   :  { %640 = vmatprep.subr.bf16.mxu1 %v771_v1  ;;  %680 = vmatprep.subr.bf16.mxu0 %v771_v1 }
  0x4a   :  { %641 = vmatpush3.bf16.msra.mxu1 %v830_v3  ;;  %681 = vmatpush3.bf16.msra.mxu0 %v830_v3  ;;  %v459_v3 = vld [vmem:[#allocation2] sm:$0x1] }
  0x4b   :  { %642 = vmatprep.subr.bf16.mxu1 %v771_v1  ;;  %682 = vmatprep.subr.bf16.mxu0 %v771_v1 }
  0x4e   :  { %643 = vmatpush3.bf16.msra.mxu1 %v839_v4  ;;  %683 = vmatpush3.bf16.msra.mxu0 %v839_v4 }
  0x4f   :  { %644 = vmatprep.subr.bf16.mxu1 %v771_v1  ;;  %684 = vmatprep.subr.bf16.mxu0 %v771_v1 }
  0x52   :  { %645 = vmatpush3.bf16.msra.mxu1 %v854_v8  ;;  %685 = vmatpush3.bf16.msra.mxu0 %v854_v8 }
  0x53   :  { %646 = vmatprep.subr.bf16.mxu1 %v771_v1  ;;  %686 = vmatprep.subr.bf16.mxu0 %v771_v1 }
  0x56   :  { %647 = vmatpush3.bf16.msra.mxu1 %v863_v10  ;;  %687 = vmatpush3.bf16.msra.mxu0 %v863_v10 }
  0x57   :  { %648 = vmatprep.subr.bf16.mxu1 %v771_v1  ;;  %688 = vmatprep.subr.bf16.mxu0 %v771_v1 }
  0x5a   :  { %649 = vmatpush3.bf16.msra.mxu1 %v872_v12  ;;  %689 = vmatpush3.bf16.msra.mxu0 %v872_v12 }
  0x5b   :  { %650 = vmatprep.subr.bf16.mxu1 %v771_v1  ;;  %690 = vmatprep.subr.bf16.mxu0 %v771_v1 }
  0x5e   :  { %651 = vmatpush3.bf16.msra.mxu1 %v881_v14  ;;  %691 = vmatpush3.bf16.msra.mxu0 %v881_v14 }
  0x61   :  { %653 = vmatmul.mubr.bf16.vlgmr.msra.gmra.mrb[4].mxu1 %v262_v18  ;;  %693 = vmatmul.mubr.bf16.vlgmr.msra.gmra.mrb[4].mxu0 %v347_v19 }
  0xf4   :  { %v215_v26 = vpop.f32.mrb[0].mxu1  ;;  %v255_v27 = vpop.f32.mrb[0].mxu0 }
  0xf5   :  { %v256_v28 = vadd.f32 %v255_v27, %v215_v26  ;;  %v594_v29 = vpop.f32.mrb[1].mxu1  ;;  %v614_v30 = vpop.f32.mrb[1].mxu0 }
  0xf6   :  { %v218_v31 = vpop.f32.mrb[2].mxu1  ;;  %v258_v32 = vpop.f32.mrb[2].mxu0 }
  0xf7   :  { %v595_v33 = vpop.f32.mrb[3].mxu1  ;;  %v615_v34 = vpop.f32.mrb[3].mxu0 }
 0x134   :  { %v340_v35 = vpop.f32.mrb[4].mxu1  ;;  %v425_v36 = vpop.f32.mrb[4].mxu0 }
 0x135   :  { %v431_v37 = vmul.f32 %v425_v36, %v340_v35  ;;  %v654_v38 = vpop.f32.mrb[5].mxu1  ;;  %v694_v39 = vpop.f32.mrb[5].mxu0 }
 0x136   :  { %v343_v40 = vpop.f32.mrb[6].mxu1  ;;  %v428_v41 = vpop.f32.mrb[6].mxu0 }
 0x137   :  { %v432_v42 = vmax.f32 %v431_v37, 1e-16  ;;  %v655_v43 = vpop.f32.mrb[7].mxu1  ;;  %v695_v44 = vpop.f32.mrb[7].mxu0 }
 0x139   :  { %721 = vrsqrt.f32 %v432_v42 }
 0x143   :  { %v722_v45 = vpop.eup %721 }
 0x144   :  { %v434_v46 = vmul.f32 %v722_v45, %v256_v28 }
 0x146   :  { %v435_v48 = vsub.f32 1.0, %v434_v46 }
 0x148   :  { %v437_v49 = vmul.f32 %v436_v47, %v435_v48 }
 0x14a   :  { %v439_v50 = vsel %vm438_vm1, %v437_v49, 0.0 }
 0x14b   :  { %440 = vadd.xlane.f32.xlu0 %v439_v50 }
 0x14f   :  { %450 = vadd.xlane.f32.xlu0 %v449_v51 }
 0x1d8   :  { %v441_v52 = vpop.xlane.xlu0 %440 }
 0x1d9   :  { %v442_v53 = vrot.slane %v441_v52, 4 }
 0x1db   :  { %v443_v54 = vadd.f32 %v442_v53, %v441_v52 }
 0x1dc   :  { %v451_v55 = vpop.xlane.xlu0 %450 }
 0x1dd   :  { %v444_v56 = vrot.slane %v443_v54, 2  ;;  %v452_v57 = vrot.slane %v451_v55, 4 }
 0x1df   :  { %v453_v58 = vadd.f32 %v452_v57, %v451_v55  ;;  %v445_v59 = vadd.f32 %v444_v56, %v443_v54 }
 0x1e1   :  { %v454_v60 = vrot.slane %v453_v58, 2  ;;  %v446_v61 = vrot.slane %v445_v59, 1 }
 0x1e3   :  { %v455_v62 = vadd.f32 %v454_v60, %v453_v58  ;;  %v447_v63 = vadd.f32 %v446_v61, %v445_v59 }
 0x1e5   :  { %705 = vpush %v447_v63  ;;  %v456_v0 = vrot.slane %v455_v62, 1 }
 0x1e7   :  { %v457_v2 = vadd.f32 %v456_v0, %v455_v62 }
 0x1e9   :  { %707 = vpush %v457_v2 }
 0x216   :  { %s706_s13 = spop %705 }
 0x217   :  { %v460_v1 = vstv %s706_s13 }
 0x218   :  { %v461_v4 = vadd.f32 %v460_v1, %v459_v3 }
 0x21a   :  { %463 = vst.msk [vmem:[#allocation2] sm:$0x1] %vm107_vm2, %v461_v4  ;;  %s708_s16 = spop %707 }
 0x21b   :  { %v465_v6 = vstv %s708_s16 }
 0x21c   :  { %734 = shalt.err (!%p731_p4)
}
 0x21d   :  { %s735_s21 = scalar_lea.hbm %s996_s4, 16 }
 0x21e   :  { %p736_p5 = scmp.ne.s32.totalorder %s996_s4, %s735_s21  ;;  %p739_p6 = scmp.lt.u32.totalorder %s735_s21, %s996_s4 }
 0x220   :  { %p741_p7 = pnand %p739_p6, %p736_p5 }
 0x222   :  { %744 = shalt.err (!%p741_p7)
}
 0x223   :  { %477 = dma.vmem_to_hbm [thread:$0]  %s475_s12, 16, %s996_s4, [#allocation3]   ;;  %v466_v7 = vadd.f32 %v465_v6, %v464_v5 }
 0x224   :  { %s745_s28 = scalar_lea.vmem %s485_s15, 16  ;;  %s749_s29 = scalar_lea.vmem %s485_s15, 32 }
 0x225   :  { %467 = vst.msk [vmem:[#allocation4] sm:$0x1] %vm107_vm2, %v466_v7  ;;  %p746_p8 = scmp.ne.s32.totalorder %s485_s15, %s745_s28  ;;  %p750_p9 = scmp.lt.s32.totalorder %s485_s15, %s485_s15 }
 0x226   :  { %p751_p10 = scmp.lt.s32.totalorder %s749_s29, %s745_s28 }
 0x228   :  { %p752_p11 = por %p751_p10, %p750_p9 }
 0x22a   :  { %p753_p12 = pnand %p752_p11, %p746_p8 }
 0x22c   :  { %756 = shalt.err (!%p753_p12)
}
 0x22d   :  { %s757_s0 = scalar_lea.hbm %s997_s5, 16 }
 0x22e   :  { %p758_p13 = scmp.ne.s32.totalorder %s997_s5, %s757_s0  ;;  %p761_p0 = scmp.lt.u32.totalorder %s757_s0, %s997_s5 }
 0x230   :  { %p763_p1 = pnand %p761_p0, %p758_p13 }
 0x232   :  { %766 = shalt.err (!%p763_p1)
}
 0x233   :  { %487 = dma.vmem_to_hbm [thread:$0]  %s485_s15, 16, %s997_s5, [#allocation5]  }
 0x234   :  { %767 = dma.done.wait [#allocation3], 16  }
 0x235   :  { %768 = vsyncadd [#allocation3], 4294967280 }
 0x236   :  { %769 = dma.done.wait [#allocation5], 16  }
 0x237   :  { %770 = vsyncadd [#allocation5], 4294967280 }
 0x238   :  { %494 = vsyncpa [#allocation3], 1 }
 0x239   :  { %495 = vsyncpa [#allocation5], 1 }

</bundles_post_ra>
